<compile_context>
chip_gen: v7x
topology: tpu7x:2x2x1
jax: 0.10.0
libtpu: 0.0.40
codegen_flags: <defaults>
</compile_context>

<pallas_src>
import jax
import jax.numpy as jnp
from jax.experimental import pallas as pl
from jax.experimental.pallas import tpu as pltpu


def _round_up(n, m):
    return ((n + m - 1) // m) * m


def _sublane_multiple(dtype):
    # Native sublane packing: 8 rows for 4-byte, 16 for 2-byte, 32 for 1-byte.
    return max(8, 32 // jnp.dtype(dtype).itemsize)


def _vmem_capacity_bytes():
    # Per-TensorCore VMEM: 128 MiB on v5e/v6e, 64 MiB on v7x.
    try:
        return int(pltpu.get_tpu_info().vmem_capacity_bytes)
    except Exception:
        return 64 * 1024 * 1024  # conservative fallback (v7x)


# --------------------------------- kernels ----------------------------------

def _value_proj_kernel(x_ref, wv_ref, bv_ref, o_ref):
    # Fast path: softmax over a size-1 axis == 1.0, so attention degenerates
    # to the value projection.  One MXU matmul + a VPU bias add per tile.
    acc = jnp.dot(x_ref[...], wv_ref[...], preferred_element_type=jnp.float32)
    o_ref[...] = (acc + bv_ref[...].astype(jnp.float32)).astype(o_ref.dtype)


def _make_exact_kernel(d_model):
    # NaN-exact path: score_i = (x_i A x_i^T + x_i.u + c) / sqrt(d) with
    # A = Wq Wk^T, u = Wq bk + Wk bq, c = bq.bk precomputed offline.  Only the
    # finiteness of the score matters: softmax over a singleton axis is 1.0
    # for finite scores and NaN otherwise.
    inv_sqrt_d = 1.0 / (float(d_model) ** 0.5)

    def kernel(x_ref, wv_ref, bv_ref, a_ref, u_ref, c_ref, o_ref, attn_ref):
        # Compute the per-row mask (1.0 or NaN) once per batch tile (inner
        # output-feature step 0) and reuse it for every output slab.
        @pl.when(pl.program_id(1) == 0)
        def _():
            x = x_ref[...].astype(jnp.float32)
            xa = jnp.dot(x, a_ref[...], preferred_element_type=jnp.float32)
            score = jnp.sum(xa * x, axis=-1, keepdims=True)
            score = score + jnp.sum(x * u_ref[...], axis=-1, keepdims=True)
            score = (score + c_ref[0]) * inv_sqrt_d
            # abs(score) < inf is False for both +/-Inf and NaN -> NaN mask,
            # matching torch.softmax over a singleton axis.
            finite = jnp.abs(score) < jnp.float32(jnp.inf)
            attn_ref[...] = jnp.where(finite, jnp.float32(1.0),
                                      jnp.float32(jnp.nan))

        v = jnp.dot(x_ref[...], wv_ref[...], preferred_element_type=jnp.float32)
        v = v + bv_ref[...].astype(jnp.float32)
        o_ref[...] = (attn_ref[...] * v).astype(o_ref.dtype)

    return kernel


# ----------------------------- parameter prep -------------------------------

def prepare_self_attention_params(wq, bq, wk, bk, wv, bv, *, block_n=None,
                                   exact_nan_softmax=False, param_dtype=None):
    """One-time parameter prep (padding / fusion / optional dtype cast).

    Do this at model-load time; `self_attention_apply` never pads or
    concatenates weights per call.  `param_dtype=jnp.bfloat16` halves weight
    HBM traffic (accumulation stays f32 via preferred_element_type).
    """
    D = wv.shape[0]
    Dp = _round_up(D, 128)

    # Output-feature slab width: one resident slab when small, otherwise stream
    # the weight in (Dp, tn) slabs.  512 is a multiple of 256 (full v6e/v7x MXU
    # width) and of 128 (v5e).
    if block_n is None:
        tn = Dp if Dp <= 512 else 512
    else:
        tn = _round_up(block_n, 128)
    grid_n = pl.cdiv(Dp, tn)
    Dwp = grid_n * tn

    def cast(a):
        return a if param_dtype is None else a.astype(param_dtype)

    params = {
        "d_model": D, "Dp": Dp, "tn": tn, "grid_n": grid_n, "Dwp": Dwp,
        "exact": bool(exact_nan_softmax),
        "wv": cast(jnp.pad(wv, ((0, Dp - D), (0, Dwp - D)))),
        "bv": cast(jnp.pad(bv, (0, Dwp - D)).reshape(1, Dwp)),
    }
    if exact_nan_softmax:
        a = jnp.pad((wq @ wk.T).astype(jnp.float32), ((0, Dp - D), (0, Dp - D)))
        u = jnp.pad((wq @ bk + wk @ bq).astype(jnp.float32), (0, Dp - D))
        params["a"] = a                              # (Dp, Dp)  f32
        params["u"] = u.reshape(1, Dp)               # (1, Dp)   f32
        params["c"] = jnp.dot(bq, bk).astype(jnp.float32).reshape(1)  # (1,) SMEM
    return params


# --------------------------------- forward ----------------------------------

def self_attention_apply(x, params, *, block_b=None):
    """SelfAttention.forward with pre-prepared (padded) parameters."""
    B, D = x.shape
    assert D == params["d_model"], "x feature dim must match d_model"
    dtype = x.dtype
    Dp, tn, grid_n, Dwp = params["Dp"], params["tn"], params["grid_n"], params["Dwp"]
    exact = params["exact"]

    x_item = jnp.dtype(dtype).itemsize
    w_item = jnp.dtype(params["wv"].dtype).itemsize
    sub = _sublane_multiple(dtype)

    # --- batch tiling: >= 2 "parallel" steps whenever B allows (v7x megacore),
    # tiles capped at 512 rows, rounded to the dtype's sublane packing.
    if block_b is None:
        if B >= 2 * sub:
            n_tiles = max(2, pl.cdiv(B, 512))
            block_b = _round_up(pl.cdiv(B, n_tiles), sub)
        else:
            block_b = _round_up(max(B, 1), sub)
    else:
        block_b = _round_up(block_b, sub)

    # --- VMEM budget (each buffer counted once; clamp to device capacity).
    cap = _vmem_capacity_bytes()
    w_bufs = 1 if grid_n == 1 else 2              # resident weight => 1 buffer
    w_bytes = w_bufs * (Dp * tn + tn) * w_item
    extra = (Dp * Dp + Dp) * 4 if exact else 0    # resident A and u (f32)
    budget = cap - (8 << 20) - w_bytes - extra
    # Shrink the batch tile if double-buffered x/out tiles would blow VMEM.
    while block_b > sub and 2 * block_b * (Dp + tn) * x_item > max(budget, 4 << 20):
        block_b = max(sub, _round_up(block_b // 2, sub))
    # TODO(synk): add K (reduction-dim) tiling with an f32 accumulator scratch
    # for d_model so large that a (Dp, tn) weight slab + one x row slab cannot
    # fit VMEM even at the minimum batch tile.

    Bp = _round_up(B, block_b)
    grid_b = Bp // block_b
    grid = (grid_b, grid_n)

    # Only pad x when actually needed (avoids an extra HBM read+write of x).
    x_in = x if (Bp == B and Dp == D) else jnp.pad(x, ((0, Bp - B), (0, Dp - D)))

    vmem_need = (2 * block_b * Dp * x_item        # x tiles (double-buffered)
                 + 2 * block_b * tn * x_item      # out tiles (double-buffered)
                 + w_bytes + extra + block_b * 4)  # weights + mask scratch
    vmem_limit = int(min(max(vmem_need + (4 << 20), 32 << 20), cap - (8 << 20)))

    # --- specs ---------------------------------------------------------------
    x_spec = pl.BlockSpec((block_b, Dp), lambda i, j: (i, 0))
    o_spec = pl.BlockSpec((block_b, tn), lambda i, j: (i, j))
    if grid_n == 1:
        # Constant over the grid: keep ONE resident copy in VMEM (single DMA,
        # no double buffering) by passing the whole array untiled.
        w_spec = pl.BlockSpec(memory_space=pltpu.MemorySpace.VMEM)
        b_spec = pl.BlockSpec(memory_space=pltpu.MemorySpace.VMEM)
    else:
        # Streamed (Dp, tn) slabs; default double buffering overlaps weight DMA
        # with the matmul of the previous slab.
        w_spec = pl.BlockSpec((Dp, tn), lambda i, j: (0, j))
        b_spec = pl.BlockSpec((1, tn), lambda i, j: (0, j))

    if exact:
        kernel = _make_exact_kernel(D)
        in_specs = [x_spec, w_spec, b_spec,
                    pl.BlockSpec(memory_space=pltpu.MemorySpace.VMEM),   # A
                    pl.BlockSpec(memory_space=pltpu.MemorySpace.VMEM),   # u
                    pl.BlockSpec(memory_space=pltpu.MemorySpace.SMEM)]   # c
        operands = (x_in, params["wv"], params["bv"],
                    params["a"], params["u"], params["c"])
        scratch = [pltpu.VMEM((block_b, 1), jnp.float32)]                # mask
    else:
        kernel = _value_proj_kernel
        in_specs = [x_spec, w_spec, b_spec]
        operands = (x_in, params["wv"], params["bv"])
        scratch = []

    out_p = pl.pallas_call(
        kernel,
        out_shape=jax.ShapeDtypeStruct((Bp, Dwp), dtype),
        grid_spec=pltpu.PrefetchScalarGridSpec(
            num_scalar_prefetch=0,
            grid=grid,
            in_specs=in_specs,
            out_specs=o_spec,
            scratch_shapes=scratch,
        ),
        compiler_params=pltpu.CompilerParams(
            dimension_semantics=("parallel", "arbitrary"),
            vmem_limit_bytes=vmem_limit,
        ),
    )(*operands)

    return out_p[:B, :D]


def self_attention(x, wq, bq, wk, bk, wv, bv, *, block_b=None,
                   exact_nan_softmax=False, param_dtype=None):
    """One-shot convenience wrapper.  Prefer prepare_...() once + apply() in a
    real model so weight padding/fusion is not paid per call."""
    params = prepare_self_attention_params(
        wq, bq, wk, bk, wv, bv,
        exact_nan_softmax=exact_nan_softmax, param_dtype=param_dtype)
    return self_attention_apply(x, params, block_b=block_b)


# --------------------------------- reference ---------------------------------

def self_attention_ref(x, wq, bq, wk, bk, wv, bv):
    # Pure-JAX reference mirroring the PyTorch forward exactly.
    q = (x @ wq + bq)[:, None, :]                       # (B,1,d)
    k = (x @ wk + bk)[:, None, :]                       # (B,1,d)
    v = x @ wv + bv                                     # (B,d)
    scores = jnp.einsum("bqd,bkd->bqk", q, k) / (q.shape[-1] ** 0.5)  # (B,1,1)
    w = jax.nn.softmax(scores, axis=-1)
    out = jnp.einsum("bqk,bkd->bqd", w, v[:, None, :])  # (B,1,d)
    return out[:, 0, :]


if __name__ == "__main__":
    B, D = 16, 32  # batch, d_model
    key = jax.random.PRNGKey(0)
    kx, kq, kbq, kk, kbk, kv, kbv = jax.random.split(key, 7)

    x = jax.random.normal(kx, (B, D), dtype=jnp.float32)
    # Deterministic init of the three Linear(d_model, d_model) layers.
    # Weights stored pre-transposed: shape (in=d_model, out=d_model).
    scale = 1.0 / (D ** 0.5)
    wq = jax.random.uniform(kq, (D, D), jnp.float32, -scale, scale)
    bq = jax.random.uniform(kbq, (D,), jnp.float32, -scale, scale)
    wk = jax.random.uniform(kk, (D, D), jnp.float32, -scale, scale)
    bk = jax.random.uniform(kbk, (D,), jnp.float32, -scale, scale)
    wv = jax.random.uniform(kv, (D, D), jnp.float32, -scale, scale)
    bv = jax.random.uniform(kbv, (D,), jnp.float32, -scale, scale)

    # One-time parameter prep (hoisted out of the per-call path).
    params_fast = prepare_self_attention_params(wq, bq, wk, bk, wv, bv)
    params_exact = prepare_self_attention_params(
        wq, bq, wk, bk, wv, bv, exact_nan_softmax=True)

    out_fast = self_attention_apply(x, params_fast)
    out_exact = self_attention_apply(x, params_exact)
    out_fast, out_exact = jax.block_until_ready((out_fast, out_exact))

    ref = self_attention_ref(x, wq, bq, wk, bk, wv, bv)
    assert out_fast.shape == (B, D) and out_exact.shape == (B, D)
    assert jnp.allclose(out_fast, ref, atol=1e-5, rtol=1e-5)
    assert jnp.allclose(out_exact, ref, atol=1e-5, rtol=1e-5)

    print("KERNEL_OK")
</pallas_src>

<mosaic_0001>
module attributes {stable_mosaic.version = 11 : i64} {
  func.func @_value_proj_kernel(%arg0: i32, %arg1: i32, %arg2: memref<8x128xf32, #tpu.memory_space<vmem>>, %arg3: memref<128x128xf32, #tpu.memory_space<vmem>>, %arg4: memref<1x128xf32, #tpu.memory_space<vmem>>, %arg5: memref<8x128xf32, #tpu.memory_space<vmem>>) attributes {dimension_semantics = [#tpu.dimension_semantics<parallel>, #tpu.dimension_semantics<arbitrary>], iteration_bounds = array<i64: 2, 1>, scalar_prefetch = 0 : i64, scratch_operands = 0 : i64, tpu.core_type = #tpu.core_type<tc>, window_params = [{transform_indices = @transform_0, window_bounds = array<i64: 8, 128>}, {pipeline_mode = #tpu.pipeline_mode<synchronous>, transform_indices = @transform_1, window_bounds = array<i64: 128, 128>}, {pipeline_mode = #tpu.pipeline_mode<synchronous>, transform_indices = @transform_2, window_bounds = array<i64: 1, 128>}, {transform_indices = @transform_3, window_bounds = array<i64: 8, 128>}]} {
    %c0 = arith.constant 0 : index
    %c0_0 = arith.constant 0 : index
    %0 = vector.load %arg2[%c0, %c0_0] : memref<8x128xf32, #tpu.memory_space<vmem>>, vector<8x128xf32>
    %c0_1 = arith.constant 0 : index
    %c0_2 = arith.constant 0 : index
    %1 = vector.load %arg3[%c0_1, %c0_2] : memref<128x128xf32, #tpu.memory_space<vmem>>, vector<128x128xf32>
    %cst = arith.constant dense<0.000000e+00> : vector<8x128xf32>
    %2 = tpu.matmul %0, %1, %cst {dimension_numbers = #tpu.dot_dimension_numbers<[1], [0], [0], [1], [0, 0, 1, 1], [], []>} : vector<8x128xf32>, vector<128x128xf32>, vector<8x128xf32> -> vector<8x128xf32>
    %c0_3 = arith.constant 0 : index
    %c0_4 = arith.constant 0 : index
    %3 = vector.load %arg4[%c0_3, %c0_4] : memref<1x128xf32, #tpu.memory_space<vmem>>, vector<1x128xf32>
    %4 = vector.broadcast %3 : vector<1x128xf32> to vector<8x128xf32>
    %5 = arith.addf %2, %4 : vector<8x128xf32>
    %c0_5 = arith.constant 0 : index
    %c0_6 = arith.constant 0 : index
    %6 = vector.load %arg5[%c0_5, %c0_6] : memref<8x128xf32, #tpu.memory_space<vmem>>, vector<8x128xf32>
    tpu.vector_store %arg5[%c0_5, %c0_6], %5 {strides = array<i32>} : memref<8x128xf32, #tpu.memory_space<vmem>>, vector<8x128xf32>,
    return
  }
  func.func @transform_0(%arg0: i32, %arg1: i32) -> (i32, i32) {
    %c0_i32 = arith.constant 0 : i32
    %c0_i32_0 = arith.constant 0 : i32
    return %arg0, %c0_i32 : i32, i32
  }
  func.func @transform_1(%arg0: i32, %arg1: i32) -> (i32, i32) {
    %c0_i32 = arith.constant 0 : i32
    %c0_i32_0 = arith.constant 0 : i32
    %c0_i32_1 = arith.constant 0 : i32
    return %c0_i32, %c0_i32_0 : i32, i32
  }
  func.func @transform_2(%arg0: i32, %arg1: i32) -> (i32, i32) {
    %c0_i32 = arith.constant 0 : i32
    %c0_i32_0 = arith.constant 0 : i32
    %c0_i32_1 = arith.constant 0 : i32
    return %c0_i32, %c0_i32_0 : i32, i32
  }
  func.func @transform_3(%arg0: i32, %arg1: i32) -> (i32, i32) {
    %c0_i32 = arith.constant 0 : i32
    return %arg0, %arg1 : i32, i32
  }
}

</mosaic_0001>

<bundles_post_ra>
// kernel: tpu_custom_call.1
= control target key start
LH: loop header
LB: loop body
LE: loop exit
PB: predicated region body
PF: predicated region fallthrough
CT: control target
= control target key end

     0   :  { %8 = vsyncpa [#allocation3], 0  ;;  %s982_s0 = inlined_call_operand.hbm [shape: f32[16,128], index: 0, kind: input, shape index: {}]   ;;  %s983_s1 = inlined_call_operand.hbm [shape: f32[128,128], index: 1, kind: input, shape index: {}]   ;;  %s984_s2 = inlined_call_operand.vmem [shape: f32[1,128], index: 2, kind: input, shape index: {}]   ;;  %s985_s3 = inlined_call_operand.hbm [shape: f32[16,128], index: 3, kind: output, shape index: {}]  }
   0x1   :  { %10 = vsyncpa [#allocation3 + $0x1], 0 }
   0x2   :  { %11 = vsyncpa [#allocation6], 0 }
   0x3   :  { %12 = vsyncpa [#allocation4], 0 }
   0x4   :  { %14 = vsyncpa [#allocation4 + $0x1], 0  ;;  %s758_s12 = smov 0   ;;  %s760_s13 = smov 0  }
   0x5   :  { %s762_s14 = smov 0   ;;  %s764_s15 = smov 0  }
   0x6   :  { %s766_s16 = smov 0   ;;  %s768_s17 = smov 0  }
   0x7 LB: > { %s414_s18 = sadd.s32 4294967295, %s728_s17   ;;  %s415_s19 = sadd.s32 4294967294, %s728_s17   ;;  %s728_s17 = sphi %s768_s17, %s20_s17   ;;  %s724_s16 = sphi %s766_s16, %s1009_s16   ;;  %s720_s15 = sphi %s764_s15, %s1008_s15   ;;  %s716_s14 = sphi %s762_s14, %s1007_s14   ;;  %s712_s13 = sphi %s760_s13, %s1006_s13   ;;  %s708_s12 = sphi %s758_s12, %s1005_s12  }
   0x8   : > { %p52_p0 = scmp.ne.s32.totalorder %s712_s13, %s708_s12  ;;  %p792_p1 = scmp.eq.s32.totalorder %s414_s18, 0 }
   0x9   : > { %p796_p2 = scmp.eq.s32.totalorder %s414_s18, 1  ;;  %p126_p3 = scmp.eq.s32.totalorder %s415_s19, 1 }
   0xa   : > { %s990_s20 = scalar_select %p792_p1, 1, 0 }
   0xb   : > { %s991_s21 = scalar_select %p796_p2, 1, 0 }
   0xc   : > { %p802_p4 = por %p792_p1, %p52_p0  ;;  %p416_p5 = scmp.ge.s32.totalorder %s728_s17, 1 }
   0xd   : > { %p807_p6 = por %p126_p3, %p52_p0  ;;  %p133_p7 = scmp.lt.s32.totalorder %s728_s17, 3 }
   0xe   : > { %s992_s22 = scalar_select %p802_p4, 1, 0 }
   0xf   : > { %s993_s23 = scalar_select %p807_p6, 1, 0 }
  0x10   : > { %p812_p8 = pnand %p416_p5, %p133_p7  ;;  %s730_s25 = smov [#allocation5]  }
  0x11   : > { %s145_s26 = sshll.u32 %s730_s25, 4  ;;  %s32_s28 = sadd.s32 1, %s724_s16  ;;  %s146_s26 = int_to_ptr.vmem [resolvable:$true] %s145_s26 }
  0x12   : > { %s994_s24 = scalar_select %p812_p8, 1, 0 }
  0x13   : > { %p514_p9 = pneg %p812_p8  ;;  %s584_s4 = scalar_lea.hbm %s983_s1, 2048 }
  0x14   : > { %p585_p12 = scmp.ne.s32.totalorder %s983_s1, %s584_s4  ;;  %p591_p5 = scmp.lt.u32.totalorder %s584_s4, %s983_s1 }
  0x15   : > { %p821_p11 = pnand %p514_p9, %p792_p1 }
  0x17   : > { %p586_p13 = pneg %p821_p11 }
  0x19   : > { %p587_p0 = pnand %p586_p13, %p585_p12 }
  0x1b   : > { %p588_p3 = pneg %p587_p0 }
  0x1d   : > { %p593_p7 = pnand %p591_p5, %p588_p3 }
  0x1f   : > { %596 = shalt.err (!%p593_p7)
}
  0x20   : > { %s597_s9 = scalar_lea.vmem %s146_s26, 2048  ;;  %p605_p1 = scmp.lt.s32.totalorder %s146_s26, %s146_s26 }
  0x21   : > { %p598_p9 = scmp.ne.s32.totalorder %s146_s26, %s597_s9  ;;  %p606_p4 = scmp.lt.s32.totalorder %s597_s9, %s597_s9 }
  0x23   : > { %p600_p10 = pnand %p598_p9, %p586_p13  ;;  %p607_p8 = por %p606_p4, %p605_p1 }
  0x25   : > { %p601_p6 = pneg %p600_p10 }
  0x27   : > { %p608_p2 = pnand %p607_p8, %p601_p6 }
  0x29   : > { %611 = shalt.err (!%p608_p2)
}
  0x2a   : > { %s731_s10 = smov 128   ;;  %s732_s11 = smov 8  }
  0x2b   : > { %517 = dma.hbm_to_vmem [thread:$0]  (!%p821_p11), %s983_s1, 2048, %s146_s26, [#allocation6], %s731_s10, %s731_s10, %s732_s11  }
  0x2c   : > { %p34_p1 = scmp.ge.s32.totalorder %s32_s28, 2  ;;  %s39_s25 = sadd.s32 1, %s716_s14 }
  0x2d   : > { %p46_p2 = scmp.ne.s32.totalorder %s716_s14, %s712_s13  ;;  %p47_p4 = scmp.eq.s32.totalorder %s728_s17, 0 }
  0x2e   : > { %s1011_s28 = smov (%p34_p1, %s32_s28), 0  ;;  %p997_p8 = scmp.ne.s32.totalorder %s991_s21, 0 }
  0x2f   : > { %p848_p6 = por %p47_p4, %p46_p2  ;;  %s36_s27 = ssub.s32 %s724_s16, %s1011_s28 }
  0x30   : > { %p854_p10 = por %p997_p8, %p46_p2  ;;  %p527_p12 = scmp.lt.s32.totalorder %s728_s17, 2 }
  0x31   : > { %p37_p11 = scmp.eq.s32.totalorder %s36_s27, 0  ;;  %s162_s26 = sand.u32 1, %s716_s14  }
  0x32   : > { %s419_s4 = sshll.u32 %s162_s26, 3  ;;  %s420_s6 = sshll.u32 %s724_s16, 7 }
  0x33   : > { %s863_s5 = scalar_select %p37_p11, %s716_s14, %s39_s25  }
  0x34   : > { %s869_s9 = scalar_lea.hbm %s982_s0, %s420_s6  ;;  %s166_s21 = scalar_lea.vmem [#allocation2], %s419_s4 }
  0x35   : > { %s173_s10 = sshll.u32 %s166_s21, 4  ;;  %p875_p13 = pnand %p527_p12, %p848_p6  ;;  %s871_s10 = int_to_ptr.vmem [resolvable:$true] %s173_s10 }
  0x36   : > { %s163_s18 = scalar_lea.sflag [#allocation3], %s162_s26  ;;  %s612_s19 = scalar_lea.hbm %s869_s9, 128 }
  0x37   : > { %p613_p0 = scmp.ne.s32.totalorder %s869_s9, %s612_s19  ;;  %p614_p3 = pneg %p875_p13 }
  0x38   : > { %s617_s4 = scalar_lea.hbm %s982_s0, 256  ;;  %p618_p9 = scmp.lt.u32.totalorder %s869_s9, %s982_s0 }
  0x39   : > { %p615_p5 = pnand %p614_p3, %p613_p0  ;;  %p619_p1 = scmp.lt.u32.totalorder %s617_s4, %s612_s19 }
  0x3a   : > { %p621_p4 = scmp.lt.u32.totalorder %s612_s19, %s869_s9 }
  0x3b   : > { %p616_p7 = pneg %p615_p5  ;;  %p620_p2 = por %p619_p1, %p618_p9 }
  0x3d   : > { %p622_p6 = por %p621_p4, %p620_p2 }
  0x3f   : > { %p623_p8 = pnand %p622_p6, %p616_p7 }
  0x41   : > { %626 = shalt.err (!%p623_p8)
}
  0x42   : > { %s627_s26 = scalar_lea.vmem %s871_s10, 128  ;;  %s733_s7 = smov [#allocation2]  }
  0x43   : > { %p628_p12 = scmp.ne.s32.totalorder %s871_s10, %s627_s26  ;;  %s632_s8 = sshll.u32 %s733_s7, 4  ;;  %s633_s8 = int_to_ptr.vmem [resolvable:$false] %s632_s8 }
  0x44   : > { %s634_s21 = scalar_lea.vmem %s633_s8, 256  ;;  %p635_p5 = scmp.lt.s32.totalorder %s871_s10, %s633_s8 }
  0x45   : > { %p630_p11 = pnand %p628_p12, %p614_p3  ;;  %p636_p9 = scmp.lt.s32.totalorder %s634_s21, %s627_s26 }
  0x47   : > { %p631_p0 = pneg %p630_p11  ;;  %p637_p1 = por %p636_p9, %p635_p5 }
  0x49   : > { %p638_p2 = pnand %p637_p1, %p631_p0 }
  0x4b   : > { %641 = shalt.err (!%p638_p2)
}
  0x4c   : > { %521 = dma.hbm_to_vmem [thread:$0]  (!%p875_p13), %s869_s9, 128, %s871_s10, %s163_s18  }
  0x4d   : > { %p1000_p7 = scmp.ne.s32.totalorder %s994_s24, 0 }
  0x4e   : > { %s907_s19 = sand.u32 (!%p1000_p7), 1, %s712_s13   ;;  %p1001_p3 = scmp.ne.s32.totalorder (!%p1000_p7), %s992_s22, 0 }
  0x4f   : > { %182 = sbr.rel (%p1000_p7) target bundleno = 353 (0x161), region = 32  ;;  %s422_s25 = sshll.u32 (!%p1000_p7), %s907_s19, 3 }
  0x50   : > { %s185_s27 = scalar_lea.sflag (!%p1000_p7), [#allocation3], %s907_s19  ;;  %s913_s4 = scalar_lea.vmem (!%p1000_p7), [#allocation2], %s422_s25 }
  0x56   : > { %695 = dma.done.wait (%p1001_p3), %s185_s27, 128  }
  0x57   : > { %697 = vsyncadd (%p1001_p3), %s185_s27, 4294967168  ;;  %p1002_p13 = scmp.ne.s32.totalorder %s990_s20, 0 }
  0x59   : > { %699 = dma.done.wait (%p1002_p13), [#allocation6], 2048  }
  0x5a   : > { %701 = vsyncadd (%p1002_p13), [#allocation6], 4294965248  ;;  %v734_v0 = vmov 0.0|0.0   ;;  %vm735_vm0 = vmmov 0   ;;  %v736_v1 = vmov 0.0   ;;  %v216_v2 = vld [vmem:[#allocation5] sm:$0xff] }
  0x5b   : > { %482 = vmatprep.subr.bf16.mxu0 %v734_v0  ;;  %479 = vmatprep.mubr.msk.f32.mxu0 %vm735_vm0, %v736_v1  ;;  %v217_v3 = vld [vmem:[#allocation5 + $0x8] sm:$0xff]  ;;  %v218_v4 = vld [vmem:[#allocation5 + $0x10] sm:$0xff]  ;;  %v219_v6 = vld [vmem:[#allocation5 + $0x18] sm:$0xff]  ;;  %s427_s24 = sshll.u32 %s720_s15, 7  ;;  %s214_s9 = scalar_lea.vmem [#allocation7], %s422_s25 }
  0x5c   : > { %v483_v5 = vpack.c.bf16 %v217_v3, %v216_v2  ;;  %v486_v7 = vpack.c.bf16 %v219_v6, %v218_v4  ;;  %v220_v8 = vld [vmem:[#allocation5 + $0x20] sm:$0xff]  ;;  %v221_v9 = vld [vmem:[#allocation5 + $0x28] sm:$0xff]  ;;  %v222_v11 = vld [vmem:[#allocation5 + $0x30] sm:$0xff]  ;;  %s325_s10 = sshll.u32 %s214_s9, 4  ;;  %s933_s29 = scalar_lea.hbm %s985_s3, %s427_s24  ;;  %s935_s10 = int_to_ptr.vmem [resolvable:$true] %s325_s10 }
  0x5d   : > { %v489_v10 = vpack.c.bf16 %v221_v9, %v220_v8  ;;  %v223_v12 = vld [vmem:[#allocation5 + $0x38] sm:$0xff]  ;;  %v224_v14 = vld [vmem:[#allocation5 + $0x40] sm:$0xff]  ;;  %v225_v15 = vld [vmem:[#allocation5 + $0x48] sm:$0xff]  ;;  %s311_s6 = scalar_lea.sflag [#allocation4], %s907_s19  ;;  %s642_s26 = scalar_lea.vmem %s935_s10, 128 }
  0x5e   : > { %484 = vmatpush3.bf16.msra.mxu0 %v483_v5  ;;  %v492_v13 = vpack.c.bf16 %v223_v12, %v222_v11  ;;  %v495_v16 = vpack.c.bf16 %v225_v15, %v224_v14  ;;  %v226_v17 = vld [vmem:[#allocation5 + $0x50] sm:$0xff]  ;;  %v227_v18 = vld [vmem:[#allocation5 + $0x58] sm:$0xff]  ;;  %v228_v20 = vld [vmem:[#allocation5 + $0x60] sm:$0xff]  ;;  %p643_p4 = scmp.ne.s32.totalorder %s935_s10, %s642_s26  ;;  %s737_s15 = smov [#allocation7]  }
  0x5f   : > { %485 = vmatprep.subr.bf16.mxu0 %v734_v0  ;;  %v498_v19 = vpack.c.bf16 %v227_v18, %v226_v17  ;;  %v229_v21 = vld [vmem:[#allocation5 + $0x68] sm:$0xff]  ;;  %v230_v23 = vld [vmem:[#allocation5 + $0x70] sm:$0xff]  ;;  %v231_v24 = vld [vmem:[#allocation5 + $0x78] sm:$0xff]  ;;  %s646_s7 = sshll.u32 %s737_s15, 4  ;;  %s647_s7 = int_to_ptr.vmem [resolvable:$false] %s646_s7 }
  0x60   : > { %v501_v22 = vpack.c.bf16 %v229_v21, %v228_v20  ;;  %v504_v25 = vpack.c.bf16 %v231_v24, %v230_v23  ;;  %v215_v26 = vld [vmem:[%s913_s4] sm:$0xff]  ;;  %p644_p6 = pnand %p643_p4, %p854_p10  ;;  %s648_s8 = scalar_lea.vmem %s647_s7, 256 }
  0x61   : > { %v425_v27 = vld [vmem:[%s984_s2] ss:$0 sm:$0xff]  ;;  %p649_p12 = scmp.lt.s32.totalorder %s935_s10, %s647_s7  ;;  %p650_p11 = scmp.lt.s32.totalorder %s648_s8, %s642_s26 }
  0x62   : > { %487 = vmatpush3.bf16.msra.mxu0 %v486_v7  ;;  %p645_p8 = pneg %p644_p6 }
  0x63   : > { %488 = vmatprep.subr.bf16.mxu0 %v734_v0  ;;  %p651_p0 = por %p650_p11, %p649_p12 }
  0x65   : > { %p652_p5 = pnand %p651_p0, %p645_p8 }
  0x66   : > { %490 = vmatpush3.bf16.msra.mxu0 %v489_v10 }
  0x67   : > { %491 = vmatprep.subr.bf16.mxu0 %v734_v0 }
  0x6a   : > { %493 = vmatpush3.bf16.msra.mxu0 %v492_v13 }
  0x6b   : > { %494 = vmatprep.subr.bf16.mxu0 %v734_v0 }
  0x6e   : > { %496 = vmatpush3.bf16.msra.mxu0 %v495_v16 }
  0x6f   : > { %497 = vmatprep.subr.bf16.mxu0 %v734_v0 }
  0x72   : > { %499 = vmatpush3.bf16.msra.mxu0 %v498_v19 }
  0x73   : > { %500 = vmatprep.subr.bf16.mxu0 %v734_v0 }
  0x76   : > { %502 = vmatpush3.bf16.msra.mxu0 %v501_v22 }
  0x77   : > { %503 = vmatprep.subr.bf16.mxu0 %v734_v0 }
  0x7a   : > { %505 = vmatpush3.bf16.msra.mxu0 %v504_v25 }
  0x7d   : > { %480 = vmatmul.mubr.f32.vlgmr.msra.gmra.mrb[0].mxu0 %v215_v26 }
 0x150   : > { %v305_v28 = vpop.f32.mrb[0].mxu0 }
 0x151   : > { %v306_v29 = vadd.f32 %v425_v27, %v305_v28  ;;  %v481_v30 = vpop.f32.mrb[1].mxu0 }
 0x153   : > { %309 = vst [vmem:[%s214_s9] sm:$0xff] %v306_v29 }
 0x154   : > { %655 = shalt.err (!%p652_p5)
}
 0x155   : > { %s656_s21 = scalar_lea.hbm %s933_s29, 128  ;;  %s660_s27 = scalar_lea.hbm %s985_s3, 256 }
 0x156   : > { %p657_p9 = scmp.ne.s32.totalorder %s933_s29, %s656_s21  ;;  %p661_p7 = scmp.lt.u32.totalorder %s933_s29, %s985_s3 }
 0x157   : > { %p662_p3 = scmp.lt.u32.totalorder %s660_s27, %s656_s21  ;;  %p664_p4 = scmp.lt.u32.totalorder %s656_s21, %s933_s29 }
 0x158   : > { %p658_p1 = pnand %p657_p9, %p854_p10 }
 0x159   : > { %p663_p13 = por %p662_p3, %p661_p7 }
 0x15a   : > { %p659_p2 = pneg %p658_p1 }
 0x15b   : > { %p665_p6 = por %p664_p4, %p663_p13 }
 0x15d   : > { %p666_p8 = pnand %p665_p6, %p659_p2 }
 0x15f   : > { %669 = shalt.err (!%p666_p8)
}
 0x160   : > { %512 = dma.vmem_to_hbm [thread:$0]  (%p854_p10), %s935_s10, 128, %s933_s29, %s311_s6  }
 0x161 PF: > { %s337_s22 = sand.u32 1, %s708_s12   ;;  %p1003_p12 = scmp.ne.s32.totalorder %s993_s23, 0 }
 0x162   : > { %p1004_p11 = scmp.ge.s32.totalorder %s728_s17, 2  ;;  %s338_s24 = scalar_lea.sflag [#allocation4], %s337_s22 }
 0x164   : > { %p523_p0 = pnand %p1004_p11, %p1003_p12 }
 0x166   : > { %703 = dma.done.wait (!%p523_p0), %s338_s24, 128  }
 0x167   : > { %705 = vsyncadd (!%p523_p0), %s338_s24, 4294967168  ;;  %s20_s17 = sadd.s32 1, %s728_s17   ;;  %s1005_s12 = smov %s712_s13 }
 0x168   : > { %p17_p5 = scmp.ge.s32.totalorder %s20_s17, 4   ;;  %s1006_s13 = smov %s716_s14 }
 0x169   : > { %s1007_s14 = smov %s863_s5  ;;  %s1008_s15 = smov %s724_s16 }
 0x16a   : > { %s1009_s16 = smov %s1011_s28  ;;  %19 = sbr.rel (!%p17_p5) target bundleno = 7 (0x7), region = 81 }
 0x171   :  { %343 = vsyncpa [#allocation3], 1 }
 0x172   :  { %345 = vsyncpa [#allocation3 + $0x1], 1 }
 0x173   :  { %346 = vsyncpa [#allocation6], 1 }
 0x174   :  { %347 = vsyncpa [#allocation4], 1 }
 0x175   :  { %349 = vsyncpa [#allocation4 + $0x1], 1 }

</bundles_post_ra>
